<compile_context>
chip_gen: v7x
topology: tpu7x:2x2x1
jax: 0.10.0
libtpu: 0.0.40
codegen_flags: <defaults>
</compile_context>

<pallas_src>
import math
import jax
import jax.numpy as jnp
from jax.experimental import pallas as pl
from jax.experimental.pallas import tpu as pltpu


def _sage_kernel(x_ref, adjT_ref, inv_deg_ref, big_theta_ref, bias_ref, out_ref):
    """One grid step = Bb batch elements, NCHW-native (N on the lane axis).

    x_ref:         (Bb, F_in, T, N)       input slab (T % 8 == 0, N % 128 == 0)
    adjT_ref:      (N, N)                 UN-normalized adjacency, transposed
                                          (adjT[j, i] = adj[i, j]); f32 or bf16 0/1
    inv_deg_ref:   (1, N)                 1/deg per destination node (0 if deg==0), f32
    big_theta_ref: (F_out*T, F_in*T)      kron(Theta^T, I_T), f32
    bias_ref:      (F_out*T, 1)           bias repeated per timestep, f32
    out_ref:       (Bb, F_out+F_in, T, N) channels [0:F_out] = layer output,
                                          channels [F_out:)  = copy of X (fused concat)
    """
    Bb, F_in, T, N = x_ref.shape
    FT_out, FT_in = big_theta_ref.shape
    F_out = FT_out // T

    # --- aggregation: ONE MXU matmul for all batches/channels/timesteps --------
    # (Bb, F_in, T, N) -> (Bb*F_in*T, N) merges leading dims only; wrapper
    # guarantees T % 8 == 0 so this reshape is layout-free for f32.
    x2d = x_ref[...].reshape(Bb * F_in * T, N)
    adjT = adjT_ref[...]
    if x2d.dtype != adjT.dtype:                      # optional bf16-adjacency MXU path
        x2d = x2d.astype(adjT.dtype)
    m2d = jnp.dot(x2d, adjT, preferred_element_type=jnp.float32)   # (Bb*F_in*T, N)
    # mean normalization: one f32 VPU multiply, broadcast over sublanes.
    m2d = m2d * inv_deg_ref[...]

    big_theta = big_theta_ref[...]                   # (F_out*T, F_in*T), hoisted
    bias = bias_ref[...]                             # (F_out*T, 1),      hoisted

    # --- Theta stage: one well-shaped matmul + one dense store per batch -------
    # Each matmul has M = F_out*T rows (256 at typical shapes) and each store is a
    # full (F_out, T, N) sublane/lane-dense slab (no masked partial stores).
    for b in range(Bb):
        mb = m2d[b * FT_in:(b + 1) * FT_in, :]                      # static, tile-aligned
        out2d = jnp.dot(big_theta, mb, preferred_element_type=jnp.float32) + bias
        out_ref[b, :F_out, :, :] = out2d.reshape(F_out, T, N).astype(out_ref.dtype)

    # --- fused concat: pass-through channels, direct ref-to-ref copy -----------
    out_ref[:, F_out:, :, :] = x_ref[...].astype(out_ref.dtype)


def _pick_batch_block(B, rows_per_batch, target_rows=256):
    """Largest divisor Bb of B with Bb*rows_per_batch <= target_rows, keeping at
    least 2 grid steps when B >= 2 (so v7x's two TensorCores both get work)."""
    best = 1
    for bb in range(1, B + 1):
        if B % bb != 0:
            continue
        if bb * rows_per_batch > target_rows:
            continue
        if B // bb >= 2 or B == 1:
            best = bb
    return best


def sage_forward(X, adj, theta, bias, *, use_bf16_adj=False):
    """X: (B, F_in, T, N) NCHW float32.  Returns (B, F_out + F_in, T, N) float32.

    use_bf16_adj: feed the N^2 aggregation matmul with an exact 0/1 bf16
    adjacency (native-bf16 MXU throughput, half adjacency VMEM); activations are
    rounded to bf16 for that matmul only.  Recommended for large N on v5e/v6e/v7x.
    """
    B, F_in, T, N = X.shape
    F_out = theta.shape[1]
    C_out = F_out + F_in

    # --- host-side layout padding (done once, outside the kernel) --------------
    T_pad = -(-T // 8) * 8            # sublane-tile multiple -> layout-free reshape
    N_pad = -(-N // 128) * 128        # lane multiple        -> lane-dense stores
    if (T_pad != T) or (N_pad != N):
        X_p = jnp.pad(X, ((0, 0), (0, 0), (0, T_pad - T), (0, N_pad - N)))
    else:
        X_p = X
    adj_p = jnp.pad(adj, ((0, N_pad - N), (0, N_pad - N))) if N_pad != N else adj

    # --- hoisted constants ------------------------------------------------------
    # Un-normalized 0/1 adjacency, transposed (kernel right-multiplies, N on lanes).
    adj_dtype = jnp.bfloat16 if use_bf16_adj else X.dtype
    adjT = jnp.transpose(adj_p).astype(adj_dtype)                       # (N_pad, N_pad)
    # Guarded reciprocal degree (zero-degree rows -> 0, never inf).
    deg = jnp.sum(adj_p, axis=-1)
    inv_deg = jnp.where(deg > 0, 1.0 / jnp.where(deg > 0, deg, 1.0), 0.0)
    inv_deg = inv_deg.reshape(1, N_pad).astype(jnp.float32)             # (1, N_pad)
    # kron(Theta^T, I_T): lets the whole (F_out, T) block come out of ONE matmul.
    big_theta = jnp.kron(jnp.transpose(theta), jnp.eye(T_pad, dtype=jnp.float32))
    big_theta = big_theta.astype(jnp.float32)                           # (F_out*T_pad, F_in*T_pad)
    bias_big = jnp.repeat(bias.astype(jnp.float32), T_pad).reshape(F_out * T_pad, 1)

    # --- grid / blocks ----------------------------------------------------------
    Bb = _pick_batch_block(B, F_in * T_pad)
    grid = (B // Bb,)

    # --- explicit VMEM budget (double-buffered X/out blocks + single-buffered consts)
    est = (2 * Bb * F_in * T_pad * N_pad * 4
           + 2 * Bb * C_out * T_pad * N_pad * 4
           + N_pad * N_pad * jnp.dtype(adj_dtype).itemsize
           + F_out * T_pad * F_in * T_pad * 4
           + (F_out * T_pad + N_pad) * 4)
    vmem_limit = int(min(max(est + (4 << 20), 32 << 20), 64 << 20))

    const = dict(pipeline_mode=pl.Buffered(1))   # constant index_map: single-buffer

    out_padded = pl.pallas_call(
        _sage_kernel,
        out_shape=jax.ShapeDtypeStruct((B, C_out, T_pad, N_pad), X.dtype),
        grid_spec=pltpu.PrefetchScalarGridSpec(
            num_scalar_prefetch=0,
            grid=grid,
            in_specs=[
                pl.BlockSpec((Bb, F_in, T_pad, N_pad), lambda g: (g, 0, 0, 0)),
                pl.BlockSpec((N_pad, N_pad), lambda g: (0, 0), **const),
                pl.BlockSpec((1, N_pad), lambda g: (0, 0), **const),
                pl.BlockSpec((F_out * T_pad, F_in * T_pad), lambda g: (0, 0), **const),
                pl.BlockSpec((F_out * T_pad, 1), lambda g: (0, 0), **const),
            ],
            out_specs=pl.BlockSpec((Bb, C_out, T_pad, N_pad), lambda g: (g, 0, 0, 0)),
        ),
        compiler_params=pltpu.CompilerParams(
            dimension_semantics=("parallel",),        # v7x: split batch steps over 2 TCs
            vmem_limit_bytes=vmem_limit),
    )(X_p, adjT, inv_deg, big_theta, bias_big)

    return out_padded[:, :, :T, :N]


def _sage_reference(X, adj, theta, bias):
    """Pure-JAX reference matching the PyTorch layer semantics."""
    I = jnp.transpose(X, (0, 2, 3, 1))                            # (B, T, N, F_in)
    deg = jnp.sum(adj, axis=-1, keepdims=True)
    inv_deg = jnp.where(deg > 0, 1.0 / jnp.where(deg > 0, deg, 1.0), 0.0)
    m = jnp.einsum('ij,btjf->btif', adj, I) * inv_deg[None, None]
    out = jnp.einsum('btjf,fo->btjo', m, theta) + bias
    return jnp.concatenate([jnp.transpose(out, (0, 3, 1, 2)), X], axis=1)


if __name__ == "__main__":
    # TODO(synk): dropout (train-only), STower masking / multi-aggregator / scaler
    # variants and the surrounding tcn/out_conv layers are outside this kernel's scope.
    B, F_in, T, N = 2, 4, 8, 16
    F_out = 32

    key = jax.random.PRNGKey(0)
    kx, kadj, kth, kb = jax.random.split(key, 4)

    X = jax.random.normal(kx, (B, F_in, T, N), dtype=jnp.float32)

    # deterministic binary adjacency (no self-loops)
    adj = jax.random.bernoulli(kadj, p=0.4, shape=(N, N)).astype(jnp.float32)
    adj = adj * (1.0 - jnp.eye(N, dtype=jnp.float32))

    # parameter init matching reset_parameters(): U(-stdv, stdv)
    stdv_t = 1.0 / math.sqrt(F_out)
    theta = jax.random.uniform(kth, (F_in, F_out), minval=-stdv_t, maxval=stdv_t,
                               dtype=jnp.float32)
    stdv_b = 1.0 / math.sqrt(F_out)
    bias = jax.random.uniform(kb, (F_out,), minval=-stdv_b, maxval=stdv_b,
                              dtype=jnp.float32)

    ref = jax.block_until_ready(_sage_reference(X, adj, theta, bias))

    # f32 path: exact match against the reference.
    out = jax.block_until_ready(sage_forward(X, adj, theta, bias))
    assert out.shape == (B, F_out + F_in, T, N), out.shape
    assert jnp.allclose(out, ref, atol=1e-5, rtol=1e-5), "f32 kernel mismatch vs reference"

    # bf16 0/1-adjacency MXU path (large-N option): adjacency exact, activations
    # rounded to bf16 for the aggregation matmul only -> looser tolerance.
    out_bf16 = jax.block_until_ready(sage_forward(X, adj, theta, bias, use_bf16_adj=True))
    assert jnp.allclose(out_bf16, ref, atol=3e-2, rtol=3e-2), "bf16 kernel mismatch vs reference"

    print("KERNEL_OK")
</pallas_src>

<mosaic_0001>
module attributes {stable_mosaic.version = 11 : i64} {
  func.func @_sage_kernel(%arg0: i32, %arg1: memref<1x4x8x128xf32, #tpu.memory_space<vmem>>, %arg2: memref<128x128xf32, #tpu.memory_space<vmem>>, %arg3: memref<1x128xf32, #tpu.memory_space<vmem>>, %arg4: memref<256x32xf32, #tpu.memory_space<vmem>>, %arg5: memref<256x1xf32, #tpu.memory_space<vmem>>, %arg6: memref<1x36x8x128xf32, #tpu.memory_space<vmem>>) attributes {dimension_semantics = [#tpu.dimension_semantics<parallel>], iteration_bounds = array<i64: 2>, scalar_prefetch = 0 : i64, scratch_operands = 0 : i64, tpu.core_type = #tpu.core_type<tc>, window_params = [{transform_indices = @transform_0, window_bounds = array<i64: 1, 4, 8, 128>}, {pipeline_mode = #tpu.pipeline_mode<synchronous>, transform_indices = @transform_1, window_bounds = array<i64: 128, 128>}, {pipeline_mode = #tpu.pipeline_mode<synchronous>, transform_indices = @transform_2, window_bounds = array<i64: 1, 128>}, {pipeline_mode = #tpu.pipeline_mode<synchronous>, transform_indices = @transform_3, window_bounds = array<i64: 256, 32>}, {pipeline_mode = #tpu.pipeline_mode<synchronous>, transform_indices = @transform_4, window_bounds = array<i64: 256, 1>}, {transform_indices = @transform_5, window_bounds = array<i64: 1, 36, 8, 128>}]} {
    %c0 = arith.constant 0 : index
    %c0_0 = arith.constant 0 : index
    %c0_1 = arith.constant 0 : index
    %c0_2 = arith.constant 0 : index
    %0 = vector.load %arg1[%c0, %c0_0, %c0_1, %c0_2] : memref<1x4x8x128xf32, #tpu.memory_space<vmem>>, vector<1x4x8x128xf32>
    %1 = vector.shape_cast %0 : vector<1x4x8x128xf32> to vector<32x128xf32>
    %c0_3 = arith.constant 0 : index
    %c0_4 = arith.constant 0 : index
    %2 = vector.load %arg2[%c0_3, %c0_4] : memref<128x128xf32, #tpu.memory_space<vmem>>, vector<128x128xf32>
    %cst = arith.constant dense<0.000000e+00> : vector<32x128xf32>
    %3 = tpu.matmul %1, %2, %cst {dimension_numbers = #tpu.dot_dimension_numbers<[1], [0], [0], [1], [0, 0, 1, 1], [], []>} : vector<32x128xf32>, vector<128x128xf32>, vector<32x128xf32> -> vector<32x128xf32>
    %c0_5 = arith.constant 0 : index
    %c0_6 = arith.constant 0 : index
    %4 = vector.load %arg3[%c0_5, %c0_6] : memref<1x128xf32, #tpu.memory_space<vmem>>, vector<1x128xf32>
    %5 = vector.broadcast %4 : vector<1x128xf32> to vector<32x128xf32>
    %6 = arith.mulf %3, %5 : vector<32x128xf32>
    %c0_7 = arith.constant 0 : index
    %c0_8 = arith.constant 0 : index
    %7 = vector.load %arg4[%c0_7, %c0_8] : memref<256x32xf32, #tpu.memory_space<vmem>>, vector<256x32xf32>
    %c0_9 = arith.constant 0 : index
    %c0_10 = arith.constant 0 : index
    %8 = vector.load %arg5[%c0_9, %c0_10] : memref<256x1xf32, #tpu.memory_space<vmem>>, vector<256x1xf32>
    %cst_11 = arith.constant dense<0.000000e+00> : vector<256x128xf32>
    %9 = tpu.matmul %7, %6, %cst_11 {dimension_numbers = #tpu.dot_dimension_numbers<[1], [0], [0], [1], [0, 0, 1, 1], [], []>} : vector<256x32xf32>, vector<32x128xf32>, vector<256x128xf32> -> vector<256x128xf32>
    %10 = vector.broadcast %8 : vector<256x1xf32> to vector<256x128xf32>
    %11 = arith.addf %9, %10 : vector<256x128xf32>
    %12 = vector.shape_cast %11 : vector<256x128xf32> to vector<32x8x128xf32>
    %c0_12 = arith.constant 0 : index
    %c0_13 = arith.constant 0 : index
    %c0_14 = arith.constant 0 : index
    %c0_15 = arith.constant 0 : index
    %13 = vector.load %arg6[%c0_12, %c0_13, %c0_14, %c0_15] : memref<1x36x8x128xf32, #tpu.memory_space<vmem>>, vector<1x32x8x128xf32>
    %14 = vector.shape_cast %13 : vector<1x32x8x128xf32> to vector<32x8x128xf32>
    %15 = vector.shape_cast %12 : vector<32x8x128xf32> to vector<1x32x8x128xf32>
    tpu.vector_store %arg6[%c0_12, %c0_13, %c0_14, %c0_15], %15 {strides = array<i32>} : memref<1x36x8x128xf32, #tpu.memory_space<vmem>>, vector<1x32x8x128xf32>,
    %c0_16 = arith.constant 0 : index
    %c0_17 = arith.constant 0 : index
    %c0_18 = arith.constant 0 : index
    %c0_19 = arith.constant 0 : index
    %16 = vector.load %arg1[%c0_16, %c0_17, %c0_18, %c0_19] : memref<1x4x8x128xf32, #tpu.memory_space<vmem>>, vector<1x4x8x128xf32>
    %c0_20 = arith.constant 0 : index
    %c32 = arith.constant 32 : index
    %c0_21 = arith.constant 0 : index
    %c0_22 = arith.constant 0 : index
    %17 = vector.load %arg6[%c0_20, %c32, %c0_21, %c0_22] : memref<1x36x8x128xf32, #tpu.memory_space<vmem>>, vector<1x4x8x128xf32>
    tpu.vector_store %arg6[%c0_20, %c32, %c0_21, %c0_22], %16 {strides = array<i32>} : memref<1x36x8x128xf32, #tpu.memory_space<vmem>>, vector<1x4x8x128xf32>,
    return
  }
  func.func @transform_0(%arg0: i32) -> (i32, i32, i32, i32) {
    %c0_i32 = arith.constant 0 : i32
    %c0_i32_0 = arith.constant 0 : i32
    %c0_i32_1 = arith.constant 0 : i32
    %c0_i32_2 = arith.constant 0 : i32
    return %arg0, %c0_i32, %c0_i32_0, %c0_i32_1 : i32, i32, i32, i32
  }
  func.func @transform_1(%arg0: i32) -> (i32, i32) {
    %c0_i32 = arith.constant 0 : i32
    %c0_i32_0 = arith.constant 0 : i32
    %c0_i32_1 = arith.constant 0 : i32
    return %c0_i32, %c0_i32_0 : i32, i32
  }
  func.func @transform_2(%arg0: i32) -> (i32, i32) {
    %c0_i32 = arith.constant 0 : i32
    %c0_i32_0 = arith.constant 0 : i32
    %c0_i32_1 = arith.constant 0 : i32
    return %c0_i32, %c0_i32_0 : i32, i32
  }
  func.func @transform_3(%arg0: i32) -> (i32, i32) {
    %c0_i32 = arith.constant 0 : i32
    %c0_i32_0 = arith.constant 0 : i32
    %c0_i32_1 = arith.constant 0 : i32
    return %c0_i32, %c0_i32_0 : i32, i32
  }
  func.func @transform_4(%arg0: i32) -> (i32, i32) {
    %c0_i32 = arith.constant 0 : i32
    %c0_i32_0 = arith.constant 0 : i32
    %c0_i32_1 = arith.constant 0 : i32
    return %c0_i32, %c0_i32_0 : i32, i32
  }
  func.func @transform_5(%arg0: i32) -> (i32, i32, i32, i32) {
    %c0_i32 = arith.constant 0 : i32
    %c0_i32_0 = arith.constant 0 : i32
    %c0_i32_1 = arith.constant 0 : i32
    %c0_i32_2 = arith.constant 0 : i32
    return %arg0, %c0_i32, %c0_i32_0, %c0_i32_1 : i32, i32, i32, i32
  }
}

</mosaic_0001>

<bundles_post_ra>
// kernel: tpu_custom_call.1
= control target key start
LH: loop header
LB: loop body
LE: loop exit
PB: predicated region body
PF: predicated region fallthrough
CT: control target
= control target key end

     0   :  { %10 = vsyncpa [#allocation3], 0  ;;  %s1808_s0 = inlined_call_operand.vmem [shape: f32[2,4,8,128], index: 0, kind: input, shape index: {}]   ;;  %s1809_s1 = inlined_call_operand.vmem [shape: f32[128,128], index: 1, kind: input, shape index: {}]   ;;  %s1810_s2 = inlined_call_operand.vmem [shape: f32[1,128], index: 2, kind: input, shape index: {}]   ;;  %s1811_s3 = inlined_call_operand.vmem [shape: f32[256,32], index: 3, kind: input, shape index: {}]   ;;  %s1812_s4 = inlined_call_operand.vmem [shape: f32[256,1], index: 4, kind: input, shape index: {}]   ;;  %s1813_s5 = inlined_call_operand.hbm [shape: f32[2,36,8,128], index: 5, kind: output, shape index: {}]  }
   0x1   :  { %12 = vsyncpa [#allocation3 + $0x1], 0  ;;  %s1387_s18 = smov 0   ;;  %s1389_s19 = smov 0  }
   0x2   :  { %s1391_s20 = smov 0   ;;  %s1393_s21 = smov 0  }
   0x3 LB: > { %s1408_s22 = sadd.s32 4294967295, %s1351_s21   ;;  %s1002_s23 = sadd.s32 4294967294, %s1351_s21   ;;  %s1351_s21 = sphi %s1393_s21, %s1819_s21   ;;  %s1347_s20 = sphi %s1391_s20, %s1818_s20   ;;  %s1343_s19 = sphi %s1389_s19, %s1817_s19   ;;  %s1339_s18 = sphi %s1387_s18, %s1816_s18  }
   0x4   : > { %s1412_s24 = sadd.s32 1, %s1351_s21   ;;  %s135_s25 = sadd.s32 1, %s1347_s20 }
   0x5   : > { %s132_s26 = ssub.s32 %s1351_s21, %s1412_s24  ;;  %p145_p0 = scmp.ne.s32.totalorder %s1347_s20, %s1343_s19 }
   0x6   : > { %p133_p1 = scmp.eq.s32.totalorder %s132_s26, 0  ;;  %p146_p2 = scmp.eq.s32.totalorder %s1408_s22, 1 }
   0x7   : > { %p151_p3 = scmp.ne.s32.totalorder %s1343_s19, %s1339_s18  ;;  %p152_p4 = scmp.eq.s32.totalorder %s1002_s23, 1 }
   0x8   : > { %s1423_s27 = scalar_select %p133_p1, %s1347_s20, %s135_s25  }
   0x9   : > { %p1425_p5 = por %p146_p2, %p145_p0  ;;  %p1429_p6 = por %p152_p4, %p151_p3 }
   0xa   : > { %p1005_p7 = scmp.ge.s32.totalorder %s1351_s21, 1  ;;  %p190_p8 = scmp.lt.s32.totalorder %s1351_s21, 3 }
   0xc   : > { %p191_p9 = pnand %p1005_p7, %p190_p8 }
   0xd   : > { %v227_v0 = vld [vmem:[%s1809_s1] sm:$0xff] (!%p191_p9)  ;;  %v228_v1 = vld [vmem:[%s1809_s1 + $0x8] sm:$0xff] (!%p191_p9)  ;;  %v229_v2 = vld [vmem:[%s1809_s1 + $0x10] sm:$0xff] (!%p191_p9)  ;;  %s215_s11 = sand.u32 (!%p191_p9), 1, %s1343_s19   ;;  %p218_p10 = scmp.lt.s32.totalorder (!%p191_p9), %s1408_s22, 1  ;;  %vm563_vm0 = vcmask (!%p191_p9), 261120  }
   0xe   : > { %194 = sbr.rel (%p191_p9) target bundleno = 547 (0x223), region = 40  ;;  %v1199_v3 = vpack.c.bf16 (!%p191_p9), %v228_v1, %v227_v0  ;;  %v230_v4 = vld [vmem:[%s1809_s1 + $0x18] sm:$0xff] (!%p191_p9)  ;;  %v231_v6 = vld [vmem:[%s1809_s1 + $0x20] sm:$0xff] (!%p191_p9)  ;;  %v232_v7 = vld [vmem:[%s1809_s1 + $0x28] sm:$0xff] (!%p191_p9)  ;;  %v1353_v30 = vmov (!%p191_p9), 0   ;;  %s1354_s10 = smov (!%p191_p9), [#allocation2]  }
   0xf   : > { %s1243_s14 = smul.u32 (!%p191_p9), 288, %s215_s11  ;;  %v1203_v5 = vpack.c.bf16 (!%p191_p9), %v230_v4, %v229_v2  ;;  %v1207_v8 = vpack.c.bf16 (!%p191_p9), %v232_v7, %v231_v6  ;;  %v233_v9 = vld [vmem:[%s1809_s1 + $0x30] sm:$0xff] (!%p191_p9)  ;;  %v234_v10 = vld [vmem:[%s1809_s1 + $0x38] sm:$0xff] (!%p191_p9)  ;;  %v235_v16 = vld [vmem:[%s1809_s1 + $0x40] sm:$0xff] (!%p191_p9)  ;;  %1288 = vset.pattern.permute.xlu1 (!%p191_p9), %v1353_v30  ;;  %1287 = vset.pattern.permute.xlu0 (!%p191_p9), %v1353_v30 }
  0x10   : > { %1200 = vmatprep.subr.bf16.mxu0 (!%p191_p9), %v1199_v3  ;;  %v1211_v15 = vpack.c.bf16 (!%p191_p9), %v234_v10, %v233_v9  ;;  %v236_v17 = vld [vmem:[%s1809_s1 + $0x48] sm:$0xff] (!%p191_p9)  ;;  %v237_v19 = vld [vmem:[%s1809_s1 + $0x50] sm:$0xff] (!%p191_p9)  ;;  %v238_v20 = vld [vmem:[%s1809_s1 + $0x58] sm:$0xff] (!%p191_p9) }
  0x11   : > { %1202 = vmatpush3.bf16.msra.mxu0 (!%p191_p9), %v1199_v3  ;;  %s1467_s13 = scalar_lea.vmem (!%p191_p9), [#allocation2], %s1243_s14  ;;  %v1215_v18 = vpack.c.bf16 (!%p191_p9), %v236_v17, %v235_v16  ;;  %v1219_v21 = vpack.c.bf16 (!%p191_p9), %v238_v20, %v237_v19  ;;  %v239_v22 = vld [vmem:[%s1809_s1 + $0x60] sm:$0xff] (!%p191_p9)  ;;  %v240_v23 = vld [vmem:[%s1809_s1 + $0x68] sm:$0xff] (!%p191_p9)  ;;  %v241_v25 = vld [vmem:[%s1809_s1 + $0x70] sm:$0xff] (!%p191_p9) }
  0x12   : > { %1204 = vmatprep.subr.bf16.mxu0 (!%p191_p9), %v1203_v5  ;;  %v1223_v24 = vpack.c.bf16 (!%p191_p9), %v240_v23, %v239_v22  ;;  %v242_v26 = vld [vmem:[%s1809_s1 + $0x78] sm:$0xff] (!%p191_p9)  ;;  %v339_v28 = vld [vmem:[%s1811_s3] sm:$0xff] (!%p191_p9)  ;;  %v373_v31 = vld [vmem:[%s1812_s4 + $0x10] sm:$0xff] (!%p191_p9)  ;;  %s940_s30 = sshll.u32 (!%p191_p9), %s1467_s13, 4  ;;  %s1761_s30 = int_to_ptr.vmem [resolvable:$true] %s940_s30 }
  0x13   : > { %v1227_v27 = vpack.c.bf16 (!%p191_p9), %v242_v26, %v241_v25  ;;  %v347_v29 = vld [vmem:[%s1811_s3 + $0x40] sm:$0xff] (!%p191_p9)  ;;  %415 = vperm.xlu1 (!%p191_p9), %1288, %v373_v31   ;;  %v374_v33 = vld [vmem:[%s1812_s4 + $0x18] sm:$0xff] (!%p191_p9)  ;;  %v372_v34 = vld [vmem:[%s1812_s4 + $0x8] sm:$0xff] (!%p191_p9)  ;;  %s1289_s9 = scalar_lea.vmem (!%p191_p9), %s1761_s30, 4608 }
  0x14   : > { %1163 = vmatprep.mubr.msk.f32.mxu1 (!%p191_p9), %vm563_vm0, %v347_v29  ;;  %v371_v32 = vld [vmem:[%s1812_s4] sm:$0xff] (!%p191_p9)  ;;  %v376_v35 = vld [vmem:[%s1812_s4 + $0x28] sm:$0xff] (!%p191_p9)  ;;  %v378_v37 = vld [vmem:[%s1812_s4 + $0x38] sm:$0xff] (!%p191_p9)  ;;  %p1290_p11 = scmp.ne.s32.totalorder (!%p191_p9), %s1761_s30, %s1289_s9 }
  0x15   : > { %s219_s25 = scalar_select %p218_p10, %s1408_s22, 1  ;;  %1206 = vmatpush3.bf16.msra.mxu0 %v1203_v5  ;;  %405 = vperm.xlu0 %1287, %v371_v32   ;;  %v375_v36 = vld [vmem:[%s1812_s4 + $0x20] sm:$0xff]  ;;  %v377_v38 = vld [vmem:[%s1812_s4 + $0x30] sm:$0xff]  ;;  %v380_v39 = vld [vmem:[%s1812_s4 + $0x48] sm:$0xff] }
  0x16   : > { %1208 = vmatprep.subr.bf16.mxu0 %v1207_v8  ;;  %v379_v40 = vld [vmem:[%s1812_s4 + $0x40] sm:$0xff]  ;;  %v382_v41 = vld [vmem:[%s1812_s4 + $0x58] sm:$0xff]  ;;  %v381_v42 = vld [vmem:[%s1812_s4 + $0x50] sm:$0xff]  ;;  %p1291_p12 = pnand %p1290_p11, %p1425_p5 }
  0x17   : > { %s1048_s26 = sshll.u32 %s219_s25, 5  ;;  %420 = vperm.xlu1 %1288, %v374_v33   ;;  %v384_v43 = vld [vmem:[%s1812_s4 + $0x68] sm:$0xff]  ;;  %v383_v44 = vld [vmem:[%s1812_s4 + $0x60] sm:$0xff]  ;;  %v386_v45 = vld [vmem:[%s1812_s4 + $0x78] sm:$0xff] }
  0x18   : > { %s222_s12 = scalar_lea.vmem %s1808_s0, %s1048_s26  ;;  %v385_v46 = vld [vmem:[%s1812_s4 + $0x70] sm:$0xff]  ;;  %v388_v47 = vld [vmem:[%s1812_s4 + $0x88] sm:$0xff]  ;;  %v387_v48 = vld [vmem:[%s1812_s4 + $0x80] sm:$0xff]  ;;  %s1244_s26 = smul.u32 4608, %s1408_s22 }
  0x19   : > { %v223_v11 = vld [vmem:[%s222_s12] sm:$0xff]  ;;  %v918_v12 = vld [vmem:[%s222_s12 + $0x8] sm:$0xff]  ;;  %v919_v13 = vld [vmem:[%s222_s12 + $0x10] sm:$0xff]  ;;  %1210 = vmatpush3.bf16.msra.mxu0 %v1207_v8  ;;  %410 = vperm.xlu0 %1287, %v372_v34   ;;  %s1767_s22 = scalar_lea.sflag [#allocation3], %s215_s11  ;;  %p1292_p13 = pneg %p1291_p12 }
  0x1a   : > { %1137 = vmatprep.mubr.f32.mxu0 %v223_v11  ;;  %v920_v14 = vld [vmem:[%s222_s12 + $0x18] sm:$0xff]  ;;  %1041 = vst [vmem:[%s1467_s13 + $0x100] sm:$0xff] %v223_v11  ;;  %1042 = vst [vmem:[%s1467_s13 + $0x108] sm:$0xff] %v918_v12  ;;  %1212 = vmatprep.subr.bf16.mxu0 %v1211_v15  ;;  %v389_v50 = vld [vmem:[%s1812_s4 + $0x90] sm:$0xff]  ;;  %s1759_s8 = scalar_lea.hbm %s1813_s5, %s1244_s26  ;;  %s1293_s12 = sshll.u32 %s1354_s10, 4  ;;  %s1294_s12 = int_to_ptr.vmem [resolvable:$false] %s1293_s12 }
  0x1b   : > { %1043 = vst [vmem:[%s1467_s13 + $0x110] sm:$0xff] %v919_v13  ;;  %1044 = vst [vmem:[%s1467_s13 + $0x118] sm:$0xff] %v920_v14  ;;  %430 = vperm.xlu1 %1288, %v376_v35   ;;  %v390_v49 = vld [vmem:[%s1812_s4 + $0x98] sm:$0xff]  ;;  %v392_v51 = vld [vmem:[%s1812_s4 + $0xa8] sm:$0xff]  ;;  %s1295_s15 = scalar_lea.vmem %s1294_s12, 9216  ;;  %p1296_p0 = scmp.lt.s32.totalorder %s1761_s30, %s1294_s12 }
  0x1c   : > { %v391_v52 = vld [vmem:[%s1812_s4 + $0xa0] sm:$0xff]  ;;  %v394_v53 = vld [vmem:[%s1812_s4 + $0xb8] sm:$0xff]  ;;  %v393_v54 = vld [vmem:[%s1812_s4 + $0xb0] sm:$0xff]  ;;  %p1297_p1 = scmp.lt.s32.totalorder %s1295_s15, %s1289_s9 }
  0x1d   : > { %1214 = vmatpush3.bf16.msra.mxu0 %v1211_v15  ;;  %425 = vperm.xlu0 %1287, %v375_v36   ;;  %v396_v55 = vld [vmem:[%s1812_s4 + $0xc8] sm:$0xff]  ;;  %v395_v56 = vld [vmem:[%s1812_s4 + $0xc0] sm:$0xff]  ;;  %v398_v57 = vld [vmem:[%s1812_s4 + $0xd8] sm:$0xff] }
  0x1e   : > { %1216 = vmatprep.subr.bf16.mxu0 %v1215_v18  ;;  %v397_v58 = vld [vmem:[%s1812_s4 + $0xd0] sm:$0xff]  ;;  %v400_v59 = vld [vmem:[%s1812_s4 + $0xe8] sm:$0xff]  ;;  %v399_v60 = vld [vmem:[%s1812_s4 + $0xe0] sm:$0xff]  ;;  %p1298_p2 = por %p1297_p1, %p1296_p0 }
  0x1f   : > { %440 = vperm.xlu1 %1288, %v378_v37   ;;  %v402_v61 = vld [vmem:[%s1812_s4 + $0xf8] sm:$0xff]  ;;  %v401_v62 = vld [vmem:[%s1812_s4 + $0xf0] sm:$0xff]  ;;  %v1008_v63 = vld [vmem:[%s1810_s2] ss:$0 sm:$0xff] }
  0x20   : > { %v340_v10 = vld [vmem:[%s1811_s3 + $0x8] sm:$0xff]  ;;  %v350_v15 = vld [vmem:[%s1811_s3 + $0x58] sm:$0xff]  ;;  %v343_v16 = vld [vmem:[%s1811_s3 + $0x20] sm:$0xff]  ;;  %p1299_p3 = pnand %p1298_p2, %p1292_p13 }
  0x21   : > { %1218 = vmatpush3.bf16.msra.mxu0 %v1215_v18  ;;  %435 = vperm.xlu0 %1287, %v377_v38   ;;  %v348_v11 = vld [vmem:[%s1811_s3 + $0x48] sm:$0xff]  ;;  %v351_v17 = vld [vmem:[%s1811_s3 + $0x60] sm:$0xff]  ;;  %v345_v20 = vld [vmem:[%s1811_s3 + $0x30] sm:$0xff] }
  0x22   : > { %1220 = vmatprep.subr.bf16.mxu0 %v1219_v21  ;;  %v344_v18 = vld [vmem:[%s1811_s3 + $0x28] sm:$0xff]  ;;  %v346_v22 = vld [vmem:[%s1811_s3 + $0x38] sm:$0xff]  ;;  %v357_v26 = vld [vmem:[%s1811_s3 + $0x90] sm:$0xff] }
  0x23   : > { %450 = vperm.xlu1 %1288, %v380_v39   ;;  %v352_v19 = vld [vmem:[%s1811_s3 + $0x68] sm:$0xff]  ;;  %v354_v23 = vld [vmem:[%s1811_s3 + $0x78] sm:$0xff]  ;;  %v361_v30 = vld [vmem:[%s1811_s3 + $0xb0] sm:$0xff] }
  0x24   : > { %v356_v25 = vld [vmem:[%s1811_s3 + $0x88] sm:$0xff]  ;;  %v362_v31 = vld [vmem:[%s1811_s3 + $0xb8] sm:$0xff]  ;;  %v363_v32 = vld [vmem:[%s1811_s3 + $0xc0] sm:$0xff] }
  0x25   : > { %1222 = vmatpush3.bf16.msra.mxu0 %v1219_v21  ;;  %445 = vperm.xlu0 %1287, %v379_v40   ;;  %v353_v21 = vld [vmem:[%s1811_s3 + $0x70] sm:$0xff]  ;;  %v360_v29 = vld [vmem:[%s1811_s3 + $0xa8] sm:$0xff]  ;;  %v366_v35 = vld [vmem:[%s1811_s3 + $0xd8] sm:$0xff] }
  0x26   : > { %1224 = vmatprep.subr.bf16.mxu0 %v1223_v24  ;;  %v364_v33 = vld [vmem:[%s1811_s3 + $0xc8] sm:$0xff]  ;;  %v365_v34 = vld [vmem:[%s1811_s3 + $0xd0] sm:$0xff]  ;;  %v367_v36 = vld [vmem:[%s1811_s3 + $0xe0] sm:$0xff] }
  0x27   : > { %460 = vperm.xlu1 %1288, %v382_v41   ;;  %v368_v37 = vld [vmem:[%s1811_s3 + $0xe8] sm:$0xff]  ;;  %v369_v38 = vld [vmem:[%s1811_s3 + $0xf0] sm:$0xff]  ;;  %v370_v39 = vld [vmem:[%s1811_s3 + $0xf8] sm:$0xff] }
  0x29   : > { %1226 = vmatpush3.bf16.msra.mxu0 %v1223_v24  ;;  %455 = vperm.xlu0 %1287, %v381_v42   ;;  %v355_v24 = vld [vmem:[%s1811_s3 + $0x80] sm:$0xff] }
  0x2a   : > { %1228 = vmatprep.subr.bf16.mxu0 %v1227_v27 }
  0x2b   : > { %470 = vperm.xlu1 %1288, %v384_v43  }
  0x2d   : > { %1230 = vmatpush3.bf16.msra.mxu0 %v1227_v27  ;;  %465 = vperm.xlu0 %1287, %v383_v44   ;;  %v358_v27 = vld [vmem:[%s1811_s3 + $0x98] sm:$0xff] }
  0x2f   : > { %480 = vperm.xlu1 %1288, %v386_v45  }
  0x30   : > { %1138 = vmatmul.mubr.f32.vlgmr.msra.gmra.mrb[0].mxu0 %v918_v12  ;;  %v341_v12 = vld [vmem:[%s1811_s3 + $0x10] sm:$0xff] }
  0x31   : > { %1140 = vmatprep.mubr.f32.mxu0 %v919_v13  ;;  %475 = vperm.xlu0 %1287, %v385_v46   ;;  %v349_v13 = vld [vmem:[%s1811_s3 + $0x50] sm:$0xff] }
  0x33   : > { %490 = vperm.xlu1 %1288, %v388_v47  }
  0x34   : > { %1141 = vmatmul.mubr.f32.gmra.mrb[2].mxu0 %v920_v14  ;;  %v342_v14 = vld [vmem:[%s1811_s3 + $0x18] sm:$0xff] }
  0x35   : > { %1151 = vmatprep.mubr.msk.f32.mxu0 %vm563_vm0, %v339_v28  ;;  %485 = vperm.xlu0 %1287, %v387_v48   ;;  %v359_v28 = vld [vmem:[%s1811_s3 + $0xa0] sm:$0xff] }
  0x37   : > { %500 = vperm.xlu1 %1288, %v390_v49  }
  0x39   : > { %495 = vperm.xlu0 %1287, %v389_v50  }
  0x3b   : > { %510 = vperm.xlu1 %1288, %v392_v51  }
  0x3d   : > { %505 = vperm.xlu0 %1287, %v391_v52  }
  0x3f   : > { %520 = vperm.xlu1 %1288, %v394_v53  }
  0x41   : > { %515 = vperm.xlu0 %1287, %v393_v54  }
  0x43   : > { %530 = vperm.xlu1 %1288, %v396_v55  }
  0x45   : > { %525 = vperm.xlu0 %1287, %v395_v56  }
  0x47   : > { %540 = vperm.xlu1 %1288, %v398_v57  }
  0x49   : > { %535 = vperm.xlu0 %1287, %v397_v58  }
  0x4b   : > { %550 = vperm.xlu1 %1288, %v400_v59  }
  0x4d   : > { %545 = vperm.xlu0 %1287, %v399_v60  }
  0x4f   : > { %560 = vperm.xlu1 %1288, %v402_v61  }
  0x51   : > { %555 = vperm.xlu0 %1287, %v401_v62  }
  0x92   : > { %v416_v40 = vpop.permute.xlu1 %415 }
  0x94   : > { %v406_v41 = vpop.permute.xlu0 %405 }
  0x96   : > { %v421_v42 = vpop.permute.xlu1 %420 }
  0x98   : > { %v411_v43 = vpop.permute.xlu0 %410 }
  0x9a   : > { %v431_v44 = vpop.permute.xlu1 %430 }
  0x9c   : > { %v426_v45 = vpop.permute.xlu0 %425 }
  0x9e   : > { %v441_v46 = vpop.permute.xlu1 %440 }
  0xa0   : > { %v436_v47 = vpop.permute.xlu0 %435 }
  0xa2   : > { %v451_v48 = vpop.permute.xlu1 %450 }
  0xa4   : > { %v446_v49 = vpop.permute.xlu0 %445 }
  0xa6   : > { %v461_v50 = vpop.permute.xlu1 %460 }
  0xa8   : > { %v456_v51 = vpop.permute.xlu0 %455 }
  0xaa   : > { %v471_v52 = vpop.permute.xlu1 %470 }
  0xac   : > { %v466_v53 = vpop.permute.xlu0 %465 }
  0xae   : > { %v481_v54 = vpop.permute.xlu1 %480 }
  0xb0   : > { %v476_v55 = vpop.permute.xlu0 %475 }
  0xb2   : > { %v491_v56 = vpop.permute.xlu1 %490 }
  0xb4   : > { %v486_v57 = vpop.permute.xlu0 %485 }
 0x103   : > { %v1139_v0 = vpop.f32.mrb[0].mxu0 }
 0x104   : > { %v336_v1 = vmul.f32 %v1139_v0, %v1008_v63  ;;  %v309_v2 = vpop.f32.mrb[1].mxu0 }
 0x105   : > { %v335_v3 = vmul.f32 %v1008_v63, %v309_v2 }
 0x107   : > { %v1231_v4 = vpack.c.bf16 %v336_v1, %v335_v3  ;;  %v1142_v5 = vpop.f32.mrb[2].mxu0 }
 0x108   : > { %v338_v6 = vmul.f32 %v1142_v5, %v1008_v63  ;;  %v319_v7 = vpop.f32.mrb[3].mxu0 }
 0x109   : > { %v337_v8 = vmul.f32 %v1008_v63, %v319_v7  ;;  %1232 = vmatprep.subr.bf16.mxu0 %v1231_v4  ;;  %1239 = vmatprep.subr.bf16.mxu1 %v1231_v4 }
 0x10a   : > { %1234 = vmatpush3.bf16.msra.mxu0 %v1231_v4  ;;  %1241 = vmatpush3.bf16.msra.mxu1 %v1231_v4 }
 0x10b   : > { %v1235_v9 = vpack.c.bf16 %v338_v6, %v337_v8 }
 0x10d   : > { %1236 = vmatprep.subr.bf16.mxu0 %v1235_v9  ;;  %1240 = vmatprep.subr.bf16.mxu1 %v1235_v9 }
 0x10e   : > { %1238 = vmatpush3.bf16.msra.mxu0 %v1235_v9  ;;  %1242 = vmatpush3.bf16.msra.mxu1 %v1235_v9 }
 0x111   : > { %1152 = vmatmul.mubr.msk.f32.vlgmr.msra.gmra.mrb[4].mxu0 %vm563_vm0, %v340_v10  ;;  %1164 = vmatmul.mubr.msk.f32.vlgmr.msra.gmra.mrb[0].mxu1 %vm563_vm0, %v348_v11  ;;  %v501_v10 = vpop.permute.xlu1 %500  ;;  %v496_v11 = vpop.permute.xlu0 %495 }
 0x112   : > { %1154 = vmatprep.mubr.msk.f32.mxu0 %vm563_vm0, %v341_v12  ;;  %1166 = vmatprep.mubr.msk.f32.mxu1 %vm563_vm0, %v349_v13 }
 0x115   : > { %1155 = vmatmul.mubr.msk.f32.gmra.mrb[6].mxu0 %vm563_vm0, %v342_v14  ;;  %1167 = vmatmul.mubr.msk.f32.gmra.mrb[2].mxu1 %vm563_vm0, %v350_v15 }
 0x116   : > { %1157 = vmatprep.mubr.msk.f32.mxu0 %vm563_vm0, %v343_v16  ;;  %1169 = vmatprep.mubr.msk.f32.mxu1 %vm563_vm0, %v351_v17 }
 0x119   : > { %1158 = vmatmul.mubr.msk.f32.gmra.mrb[8].mxu0 %vm563_vm0, %v344_v18  ;;  %1170 = vmatmul.mubr.msk.f32.gmra.mrb[4].mxu1 %vm563_vm0, %v352_v19 }
 0x11a   : > { %1160 = vmatprep.mubr.msk.f32.mxu0 %vm563_vm0, %v345_v20  ;;  %1172 = vmatprep.mubr.msk.f32.mxu1 %vm563_vm0, %v353_v21 }
 0x11d   : > { %1161 = vmatmul.mubr.msk.f32.gmra.mrb[10].mxu0 %vm563_vm0, %v346_v22  ;;  %1173 = vmatmul.mubr.msk.f32.gmra.mrb[6].mxu1 %vm563_vm0, %v354_v23 }
 0x11e   : > { %1175 = vmatprep.mubr.msk.f32.mxu1 %vm563_vm0, %v355_v24 }
 0x121   : > { %1176 = vmatmul.mubr.msk.f32.gmra.mrb[8].mxu1 %vm563_vm0, %v356_v25 }
 0x122   : > { %1178 = vmatprep.mubr.msk.f32.mxu1 %vm563_vm0, %v357_v26  ;;  %v511_v26 = vpop.permute.xlu1 %510 }
 0x125   : > { %1179 = vmatmul.mubr.msk.f32.gmra.mrb[10].mxu1 %vm563_vm0, %v358_v27 }
 0x126   : > { %1181 = vmatprep.mubr.msk.f32.mxu1 %vm563_vm0, %v359_v28 }
 0x129   : > { %1182 = vmatmul.mubr.msk.f32.gmra.mrb[12].mxu1 %vm563_vm0, %v360_v29  ;;  %v506_v29 = vpop.permute.xlu0 %505 }
 0x12a   : > { %1184 = vmatprep.mubr.msk.f32.mxu1 %vm563_vm0, %v361_v30 }
 0x12d   : > { %1185 = vmatmul.mubr.msk.f32.gmra.mrb[14].mxu1 %vm563_vm0, %v362_v31 }
 0x12e   : > { %1187 = vmatprep.mubr.msk.f32.mxu1 %vm563_vm0, %v363_v32 }
 0x131   : > { %1188 = vmatmul.mubr.msk.f32.gmra.mrb[16].mxu1 %vm563_vm0, %v364_v33 }
 0x132   : > { %1190 = vmatprep.mubr.msk.f32.mxu1 %vm563_vm0, %v365_v34  ;;  %v521_v34 = vpop.permute.xlu1 %520 }
 0x135   : > { %1191 = vmatmul.mubr.msk.f32.gmra.mrb[18].mxu1 %vm563_vm0, %v366_v35 }
 0x136   : > { %1193 = vmatprep.mubr.msk.f32.mxu1 %vm563_vm0, %v367_v36  ;;  %v516_v36 = vpop.permute.xlu0 %515 }
 0x139   : > { %1194 = vmatmul.mubr.msk.f32.gmra.mrb[20].mxu1 %vm563_vm0, %v368_v37 }
 0x13a   : > { %1196 = vmatprep.mubr.msk.f32.mxu1 %vm563_vm0, %v369_v38 }
 0x13d   : > { %1197 = vmatmul.mubr.msk.f32.gmra.mrb[22].mxu1 %vm563_vm0, %v370_v39 }
 0x1e4   : > { %v1153_v58 = vpop.f32.mrb[4].mxu0  ;;  %v1165_v59 = vpop.f32.mrb[0].mxu1 }
 0x1e5   : > { %v732_v60 = vadd.f32 %v1153_v58, %v411_v43  ;;  %v772_v61 = vadd.f32 %v1165_v59, %v451_v48  ;;  %v726_v62 = vpop.f32.mrb[5].mxu0  ;;  %v766_v63 = vpop.f32.mrb[1].mxu1 }
 0x1e6   : > { %v727_v0 = vadd.f32 %v726_v62, %v406_v41  ;;  %v767_v1 = vadd.f32 %v766_v63, %v446_v49  ;;  %v531_v43 = vpop.permute.xlu1 %530 }
 0x1e7   : > { %886 = vst [vmem:[%s1467_s13 + $0x8] sm:$0xff] %v732_v60  ;;  %894 = vst [vmem:[%s1467_s13 + $0x48] sm:$0xff] %v772_v61 }
 0x1e8   : > { %885 = vst [vmem:[%s1467_s13] sm:$0xff] %v727_v0  ;;  %893 = vst [vmem:[%s1467_s13 + $0x40] sm:$0xff] %v767_v1  ;;  %v1156_v2 = vpop.f32.mrb[6].mxu0  ;;  %v1168_v3 = vpop.f32.mrb[2].mxu1 }
 0x1e9   : > { %v742_v4 = vadd.f32 %v1156_v2, %v421_v42  ;;  %v782_v5 = vadd.f32 %v1168_v3, %v461_v50  ;;  %v736_v6 = vpop.f32.mrb[7].mxu0  ;;  %v776_v7 = vpop.f32.mrb[3].mxu1 }
 0x1ea   : > { %v737_v8 = vadd.f32 %v736_v6, %v416_v40  ;;  %v777_v9 = vadd.f32 %v776_v7, %v456_v51  ;;  %v541_v50 = vpop.permute.xlu1 %540 }
 0x1eb   : > { %888 = vst [vmem:[%s1467_s13 + $0x18] sm:$0xff] %v742_v4  ;;  %896 = vst [vmem:[%s1467_s13 + $0x58] sm:$0xff] %v782_v5 }
 0x1ec   : > { %887 = vst [vmem:[%s1467_s13 + $0x10] sm:$0xff] %v737_v8  ;;  %895 = vst [vmem:[%s1467_s13 + $0x50] sm:$0xff] %v777_v9  ;;  %v1159_v12 = vpop.f32.mrb[8].mxu0  ;;  %v1171_v13 = vpop.f32.mrb[4].mxu1 }
 0x1ed   : > { %v752_v14 = vadd.f32 %v1159_v12, %v431_v44  ;;  %v792_v15 = vadd.f32 %v1171_v13, %v471_v52  ;;  %v746_v16 = vpop.f32.mrb[9].mxu0  ;;  %v786_v17 = vpop.f32.mrb[5].mxu1 }
 0x1ee   : > { %v747_v18 = vadd.f32 %v746_v16, %v426_v45  ;;  %v787_v19 = vadd.f32 %v786_v17, %v466_v53  ;;  %v526_v45 = vpop.permute.xlu0 %525  ;;  %v551_v59 = vpop.permute.xlu1 %550 }
 0x1ef   : > { %890 = vst [vmem:[%s1467_s13 + $0x28] sm:$0xff] %v752_v14  ;;  %898 = vst [vmem:[%s1467_s13 + $0x68] sm:$0xff] %v792_v15 }
 0x1f0   : > { %889 = vst [vmem:[%s1467_s13 + $0x20] sm:$0xff] %v747_v18  ;;  %897 = vst [vmem:[%s1467_s13 + $0x60] sm:$0xff] %v787_v19  ;;  %v1162_v20 = vpop.f32.mrb[10].mxu0  ;;  %v1174_v21 = vpop.f32.mrb[6].mxu1 }
 0x1f1   : > { %v762_v22 = vadd.f32 %v1162_v20, %v441_v46  ;;  %v802_v23 = vadd.f32 %v1174_v21, %v481_v54  ;;  %v756_v24 = vpop.f32.mrb[11].mxu0  ;;  %v796_v25 = vpop.f32.mrb[7].mxu1 }
 0x1f2   : > { %v757_v27 = vadd.f32 %v756_v24, %v436_v47  ;;  %v797_v28 = vadd.f32 %v796_v25, %v476_v55  ;;  %v536_v52 = vpop.permute.xlu0 %535  ;;  %v561_v2 = vpop.permute.xlu1 %560 }
 0x1f3   : > { %892 = vst [vmem:[%s1467_s13 + $0x38] sm:$0xff] %v762_v22  ;;  %900 = vst [vmem:[%s1467_s13 + $0x78] sm:$0xff] %v802_v23 }
 0x1f4   : > { %891 = vst [vmem:[%s1467_s13 + $0x30] sm:$0xff] %v757_v27  ;;  %899 = vst [vmem:[%s1467_s13 + $0x70] sm:$0xff] %v797_v28  ;;  %v1177_v30 = vpop.f32.mrb[8].mxu1 }
 0x1f5   : > { %v812_v31 = vadd.f32 %v1177_v30, %v491_v56  ;;  %v806_v32 = vpop.f32.mrb[9].mxu1 }
 0x1f6   : > { %v807_v33 = vadd.f32 %v806_v32, %v486_v57  ;;  %v546_v61 = vpop.permute.xlu0 %545 }
 0x1f7   : > { %902 = vst [vmem:[%s1467_s13 + $0x88] sm:$0xff] %v812_v31 }
 0x1f8   : > { %901 = vst [vmem:[%s1467_s13 + $0x80] sm:$0xff] %v807_v33  ;;  %v1180_v35 = vpop.f32.mrb[10].mxu1 }
 0x1f9   : > { %v822_v37 = vadd.f32 %v1180_v35, %v501_v10  ;;  %v816_v38 = vpop.f32.mrb[11].mxu1 }
 0x1fa   : > { %v817_v39 = vadd.f32 %v816_v38, %v496_v11  ;;  %v556_v4 = vpop.permute.xlu0 %555 }
 0x1fb   : > { %904 = vst [vmem:[%s1467_s13 + $0x98] sm:$0xff] %v822_v37 }
 0x1fc   : > { %903 = vst [vmem:[%s1467_s13 + $0x90] sm:$0xff] %v817_v39  ;;  %v1183_v40 = vpop.f32.mrb[12].mxu1 }
 0x1fd   : > { %v832_v41 = vadd.f32 %v1183_v40, %v511_v26  ;;  %v826_v42 = vpop.f32.mrb[13].mxu1 }
 0x1fe   : > { %v827_v44 = vadd.f32 %v826_v42, %v506_v29 }
 0x1ff   : > { %906 = vst [vmem:[%s1467_s13 + $0xa8] sm:$0xff] %v832_v41 }
 0x200   : > { %905 = vst [vmem:[%s1467_s13 + $0xa0] sm:$0xff] %v827_v44  ;;  %v1186_v46 = vpop.f32.mrb[14].mxu1 }
 0x201   : > { %v842_v47 = vadd.f32 %v1186_v46, %v521_v34  ;;  %v836_v48 = vpop.f32.mrb[15].mxu1 }
 0x202   : > { %v837_v49 = vadd.f32 %v836_v48, %v516_v36 }
 0x203   : > { %908 = vst [vmem:[%s1467_s13 + $0xb8] sm:$0xff] %v842_v47 }
 0x204   : > { %907 = vst [vmem:[%s1467_s13 + $0xb0] sm:$0xff] %v837_v49  ;;  %v1189_v51 = vpop.f32.mrb[16].mxu1 }
 0x205   : > { %v852_v53 = vadd.f32 %v1189_v51, %v531_v43  ;;  %v846_v54 = vpop.f32.mrb[17].mxu1 }
 0x206   : > { %v847_v55 = vadd.f32 %v846_v54, %v526_v45 }
 0x207   : > { %910 = vst [vmem:[%s1467_s13 + $0xc8] sm:$0xff] %v852_v53 }
 0x208   : > { %909 = vst [vmem:[%s1467_s13 + $0xc0] sm:$0xff] %v847_v55  ;;  %v1192_v56 = vpop.f32.mrb[18].mxu1 }
 0x209   : > { %v862_v57 = vadd.f32 %v1192_v56, %v541_v50  ;;  %v856_v58 = vpop.f32.mrb[19].mxu1 }
 0x20a   : > { %v857_v60 = vadd.f32 %v856_v58, %v536_v52 }
 0x20b   : > { %912 = vst [vmem:[%s1467_s13 + $0xd8] sm:$0xff] %v862_v57 }
 0x20c   : > { %911 = vst [vmem:[%s1467_s13 + $0xd0] sm:$0xff] %v857_v60  ;;  %v1195_v62 = vpop.f32.mrb[20].mxu1 }
 0x20d   : > { %v872_v63 = vadd.f32 %v1195_v62, %v551_v59  ;;  %v866_v0 = vpop.f32.mrb[21].mxu1 }
 0x20e   : > { %v867_v1 = vadd.f32 %v866_v0, %v546_v61 }
 0x20f   : > { %914 = vst [vmem:[%s1467_s13 + $0xe8] sm:$0xff] %v872_v63 }
 0x210   : > { %913 = vst [vmem:[%s1467_s13 + $0xe0] sm:$0xff] %v867_v1  ;;  %v1198_v3 = vpop.f32.mrb[22].mxu1 }
 0x211   : > { %v882_v5 = vadd.f32 %v1198_v3, %v561_v2  ;;  %v876_v6 = vpop.f32.mrb[23].mxu1 }
 0x212   : > { %v877_v7 = vadd.f32 %v876_v6, %v556_v4 }
 0x213   : > { %916 = vst [vmem:[%s1467_s13 + $0xf8] sm:$0xff] %v882_v5 }
 0x214   : > { %915 = vst [vmem:[%s1467_s13 + $0xf0] sm:$0xff] %v877_v7 }
 0x215   : > { %1302 = shalt.err (!%p1299_p3)
}
 0x216   : > { %s1303_s11 = scalar_lea.hbm %s1759_s8, 4608  ;;  %s1307_s17 = scalar_lea.hbm %s1813_s5, 9216 }
 0x217   : > { %p1304_p4 = scmp.ne.s32.totalorder %s1759_s8, %s1303_s11  ;;  %p1308_p9 = scmp.lt.u32.totalorder %s1759_s8, %s1813_s5 }
 0x218   : > { %p1309_p10 = scmp.lt.u32.totalorder %s1307_s17, %s1303_s11  ;;  %p1311_p12 = scmp.lt.u32.totalorder %s1303_s11, %s1759_s8 }
 0x219   : > { %p1305_p7 = pnand %p1304_p4, %p1425_p5 }
 0x21a   : > { %p1310_p11 = por %p1309_p10, %p1308_p9 }
 0x21b   : > { %p1306_p8 = pneg %p1305_p7 }
 0x21c   : > { %p1312_p13 = por %p1311_p12, %p1310_p11 }
 0x21e   : > { %p1313_p0 = pnand %p1312_p13, %p1306_p8 }
 0x220   : > { %1316 = shalt.err (!%p1313_p0)
}
 0x221   : > { %s1355_s25 = smov 128   ;;  %s1356_s26 = smov 8  }
 0x222   : > { %1245 = dma.vmem_to_hbm [thread:$0]  (%p1425_p5), %s1761_s30, 4608, %s1759_s8, %s1767_s22, %s1355_s25, %s1355_s25, %s1356_s26  }
 0x223 PF: > { %p1251_p1 = scmp.ge.s32.totalorder %s1351_s21, 2  ;;  %s955_s6 = sand.u32 1, %s1339_s18  }
 0x224   : > { %s956_s7 = scalar_lea.sflag [#allocation3], %s955_s6 }
 0x225   : > { %p1248_p2 = pnand %p1251_p1, %p1429_p6 }
 0x227   : > { %1334 = dma.done.wait (!%p1248_p2), %s956_s7, 4608  }
 0x228   : > { %1336 = vsyncadd (!%p1248_p2), %s956_s7, 4294962688  ;;  %p15_p3 = scmp.ge.s32.totalorder %s1412_s24, 4   ;;  %s1816_s18 = smov %s1343_s19 }
 0x229   : > { %s1817_s19 = smov %s1347_s20  ;;  %s1818_s20 = smov %s1423_s27 }
 0x22a   : > { %s1819_s21 = smov %s1412_s24  ;;  %17 = sbr.rel (!%p15_p3) target bundleno = 3 (0x3), region = 76 }
 0x231   :  { %961 = vsyncpa [#allocation3], 1 }
 0x232   :  { %963 = vsyncpa [#allocation3 + $0x1], 1 }

</bundles_post_ra>
